<compile_context>
chip_gen: v6e
topology: v6e:2x2x1
jax: 0.10.0
libtpu: 0.0.40
codegen_flags: <defaults>
</compile_context>

<pallas_src>
import functools

import jax
import jax.numpy as jnp
from jax import lax
from jax.experimental import pallas as pl
from jax.experimental.pallas import tpu as pltpu

IGNORE_ID = -1


def _concat_sep_kernel(ignore_id, a_len_ref, t_len_ref,
                       audio_ref, text_ref, sep_ref, out_ref,
                       ascr_ref, tscr_ref):
    """One grid step = (batch element b, channel tile c).

    audio_ref : (1, Ta, c_blk)  natural (un-padded) time extent
    text_ref  : (1, Tt, c_blk)
    sep_ref   : (1, c_blk)
    out_ref   : (1, T_out, c_blk)  T_out = requested output rows (may be unaligned)
    ascr/tscr : (T_k, c_blk) VMEM scratch, T_k = T_out rounded up to the dtype's
                sublane pack (keeps the dynamic roll on aligned shapes)
    a_len_ref / t_len_ref : (B,) int32 in SMEM (scalar prefetch)
    """
    b = pl.program_id(0)
    a_len = a_len_ref[b]
    t_len = t_len_ref[b]
    total = a_len + 1 + t_len

    T_out = out_ref.shape[1]
    Ta = audio_ref.shape[1]
    Tt = text_ref.shape[1]
    T_k = ascr_ref.shape[0]
    dt = out_ref.dtype

    # Guard against a too-small max_out_len (no-op unless pl.enable_debug_checks()).
    if pl.debug_checks_enabled():
        pl.debug_check(total <= T_out,
                       "ConcatWithSEP: a_len + 1 + t_len exceeds the output rows")

    # Stage inputs into aligned T_k-row frames.  This is VMEM-only work
    # (negligible vs. the HBM DMA); rows >= na / >= nt are never selected below.
    na = min(Ta, T_k)
    nt = min(Tt, T_k)
    ascr_ref[:na, :] = audio_ref[0, :na, :]
    tscr_ref[:nt, :] = text_ref[0, :nt, :]

    row = lax.broadcasted_iota(jnp.int32, (T_k, 1), 0)             # (T_k, 1)

    # Dynamic sublane rotate on the XLU (no MXU / O(T^2) work):
    #   text_shifted[i] = tscr[(i - (a_len + 1)) % T_k]
    # wrap-around rows are masked out by the selects below.
    text_shifted = pltpu.roll(tscr_ref[...], shift=a_len + 1, axis=0)

    sep = sep_ref[...].astype(dt)                                   # (1, c_blk)
    fill = jnp.asarray(ignore_id, dtype=dt)

    res = jnp.where(row < a_len, ascr_ref[...],
          jnp.where(row == a_len, sep,
          jnp.where(row < total, text_shifted, fill)))

    out_ref[0] = res[:T_out].astype(dt)


def _sublane_pack(dtype):
    """Sublane pack width: 8 for f32, 16 for bf16, 32 for int8/fp8."""
    itemsize = jnp.dtype(dtype).itemsize
    return max(8, 32 // max(1, itemsize))


def _pick_c_block(C, B, rows_in_flight, itemsize, budget_bytes):
    """Largest lane-aligned channel tile dividing C that fits the VMEM budget."""
    cands = [c for c in (2048, 1024, 512, 256, 128) if C % c == 0]
    if not cands:
        return C  # odd / small C: full extent (masked lane stores; correct, slower)
    c_blk = cands[-1]
    for c in cands:  # largest first: bigger DMAs, fewer per-step overheads
        if rows_in_flight * c * itemsize <= budget_bytes:
            c_blk = c
            break
    # v7x has 2 TensorCores: keep a handful of parallel grid steps available.
    while B * (C // c_blk) < 4 and c_blk > 128 and C % (c_blk // 2) == 0:
        c_blk //= 2
    return c_blk


def concat_with_sep(audio_token_encoded, audio_token_len,
                    text_token_encoded, text_token_len,
                    sep_embed, audio_first=True, ignore_id=IGNORE_ID,
                    max_out_len=None):
    """Pallas implementation of ConcatWithSEP.forward.

    Returns (out, lengths): out is (B, T_out, C) padded with ignore_id,
    lengths is (B,) int32 = a_len + 1 + t_len.  T_out is `max_out_len` if given
    (must be >= max(a_len + 1 + t_len)), else the static bound
    audio.shape[1] + 1 + text.shape[1] — this keeps the op jit-traceable (no
    host sync on the lengths, unlike torch's pad_sequence); rows beyond the
    per-batch length are ignore_id.
    """
    assert audio_token_encoded.shape[-1] == text_token_encoded.shape[-1], \
        "Inconsistency in feature dimension!"
    assert audio_token_encoded.dtype == text_token_encoded.dtype

    audio, text = audio_token_encoded, text_token_encoded
    a_len = audio_token_len.astype(jnp.int32)
    t_len = text_token_len.astype(jnp.int32)
    if not audio_first:
        audio, text = text, audio
        a_len, t_len = t_len, a_len

    B, Ta, C = audio.shape
    Tt = text.shape[1]
    dtype = audio.dtype
    itemsize = jnp.dtype(dtype).itemsize
    total_len = a_len + 1 + t_len

    # Static output length: no device->host sync, jit-friendly.
    T_out = int(max_out_len) if max_out_len is not None else Ta + 1 + Tt
    pack = _sublane_pack(dtype)
    T_k = ((T_out + pack - 1) // pack) * pack  # aligned in-kernel compute frame

    # Rows of VMEM per lane that are live at once: double-buffered pipeline
    # blocks (audio + text + sep + out) + 2 scratches + slack for temporaries.
    rows_in_flight = 2 * (Ta + Tt + T_out + 1) + 2 * T_k + 4 * T_k

    try:
        vmem_phys = int(pltpu.get_tpu_info().vmem_capacity_bytes)
    except Exception:
        vmem_phys = 64 * 2 ** 20  # v7x-safe fallback
    vmem_cap = vmem_phys * 7 // 8

    c_blk = _pick_c_block(C, B, rows_in_flight, itemsize,
                          budget_bytes=min(vmem_cap // 2, 24 * 2 ** 20))
    n_c = C // c_blk if C % c_blk == 0 else 1

    need = rows_in_flight * c_blk * itemsize
    vmem_limit = int(min(vmem_cap, max(32 * 2 ** 20, 2 * need)))

    kernel = functools.partial(_concat_sep_kernel, ignore_id)

    out = pl.pallas_call(
        kernel,
        out_shape=jax.ShapeDtypeStruct((B, T_out, C), dtype),
        grid_spec=pltpu.PrefetchScalarGridSpec(
            num_scalar_prefetch=2,
            grid=(B, n_c),
            in_specs=[
                pl.BlockSpec((1, Ta, c_blk), lambda b, c, al, tl: (b, 0, c)),
                pl.BlockSpec((1, Tt, c_blk), lambda b, c, al, tl: (b, 0, c)),
                pl.BlockSpec((1, c_blk), lambda b, c, al, tl: (0, c)),
            ],
            out_specs=pl.BlockSpec((1, T_out, c_blk),
                                   lambda b, c, al, tl: (b, 0, c)),
            scratch_shapes=[pltpu.VMEM((T_k, c_blk), dtype),
                            pltpu.VMEM((T_k, c_blk), dtype)],
        ),
        compiler_params=pltpu.CompilerParams(
            dimension_semantics=("parallel", "parallel"),
            vmem_limit_bytes=vmem_limit),
    )(a_len, t_len, audio, text, sep_embed)

    # TODO(synk): each block still DMAs all Ta/Tt rows even though only
    # a_len/t_len are used (~1.5x minimal HBM bytes); a manual pl.ANY +
    # make_async_copy chunked-DMA path would trim that further.

    return out, total_len


def _reference(audio, a_len, text, t_len, sep, ignore_id=IGNORE_ID, max_t=None):
    B, _, C = audio.shape
    seqs = [jnp.concatenate(
        [audio[i, :int(a_len[i])], sep.astype(audio.dtype), text[i, :int(t_len[i])]],
        axis=0) for i in range(B)]
    if max_t is None:
        max_t = max(int(s.shape[0]) for s in seqs)
    out = jnp.full((B, max_t, C), ignore_id, dtype=audio.dtype)
    for i, s in enumerate(seqs):
        out = out.at[i, :s.shape[0]].set(s)
    lens = jnp.array([s.shape[0] for s in seqs], dtype=jnp.int32)
    return out, lens


if __name__ == "__main__":
    key = jax.random.PRNGKey(0)
    k_sep, k_a, k_t = jax.random.split(key, 3)

    B, T_a, T_t, d = 2, 16, 8, 128

    # nn.Parameter(torch.rand((1, d)) * 1e-5) analogue
    sep_embed = jax.random.uniform(k_sep, (1, d), dtype=jnp.float32) * 1e-5

    audio = jax.random.normal(k_a, (B, T_a, d), dtype=jnp.float32)
    text = jax.random.normal(k_t, (B, T_t, d), dtype=jnp.float32)
    audio_len = jnp.array([10, 16], dtype=jnp.int32)
    text_len = jnp.array([8, 5], dtype=jnp.int32)

    # The torch module's output T is max(a_len + 1 + t_len); pass it as a static
    # bound so the kernel writes exactly that many rows (no extra slice pass).
    max_total = int(jnp.max(audio_len + 1 + text_len))

    out, out_len = concat_with_sep(audio, audio_len, text, text_len,
                                   sep_embed, audio_first=True,
                                   max_out_len=max_total)
    out = jax.block_until_ready(out)
    out_len = jax.block_until_ready(out_len)

    ref_out, ref_len = _reference(audio, audio_len, text, text_len, sep_embed,
                                  max_t=max_total)
    assert out.shape == ref_out.shape, (out.shape, ref_out.shape)
    assert jnp.array_equal(out_len, ref_len)
    assert jnp.array_equal(out, ref_out)  # pure data movement: bit-exact

    # Also exercise the jit-friendly default path (static bound T_a + 1 + T_t).
    out2, out_len2 = jax.jit(functools.partial(concat_with_sep, audio_first=True))(
        audio, audio_len, text, text_len, sep_embed)
    out2 = jax.block_until_ready(out2)
    assert out2.shape == (B, T_a + 1 + T_t, d)
    assert jnp.array_equal(out2[:, :max_total], ref_out)
    assert bool(jnp.all(out2[:, max_total:] == jnp.float32(IGNORE_ID)))
    assert jnp.array_equal(out_len2, ref_len)

    print("KERNEL_OK")
</pallas_src>

<mosaic_0001>
module attributes {stable_mosaic.version = 11 : i64} {
  func.func @_concat_sep_kernel(%arg0: i32, %arg1: i32, %arg2: memref<2xi32, #tpu.memory_space<smem>>, %arg3: memref<2xi32, #tpu.memory_space<smem>>, %arg4: memref<1x16x128xf32, #tpu.memory_space<vmem>>, %arg5: memref<1x8x128xf32, #tpu.memory_space<vmem>>, %arg6: memref<1x128xf32, #tpu.memory_space<vmem>>, %arg7: memref<1x22x128xf32, #tpu.memory_space<vmem>>, %arg8: memref<24x128xf32, #tpu.memory_space<vmem>>, %arg9: memref<24x128xf32, #tpu.memory_space<vmem>>) attributes {dimension_semantics = [#tpu.dimension_semantics<parallel>, #tpu.dimension_semantics<parallel>], iteration_bounds = array<i64: 2, 1>, scalar_prefetch = 2 : i64, scratch_operands = 2 : i64, tpu.core_type = #tpu.core_type<tc>, window_params = [{transform_indices = @transform_0, window_bounds = array<i64: 1, 16, 128>}, {transform_indices = @transform_1, window_bounds = array<i64: 1, 8, 128>}, {transform_indices = @transform_2, window_bounds = array<i64: 1, 128>}, {transform_indices = @transform_3, window_bounds = array<i64: 1, 22, 128>}]} {
    %0 = arith.index_cast %arg0 : i32 to index
    %1 = memref.load %arg2[%0] : memref<2xi32, #tpu.memory_space<smem>>
    %2 = arith.index_cast %arg0 : i32 to index
    %3 = memref.load %arg3[%2] : memref<2xi32, #tpu.memory_space<smem>>
    %c1_i32 = arith.constant 1 : i32
    %4 = arith.addi %1, %c1_i32 : i32
    %5 = arith.addi %4, %3 : i32
    %c0 = arith.constant 0 : index
    %c0_0 = arith.constant 0 : index
    %c0_1 = arith.constant 0 : index
    %6 = vector.load %arg4[%c0, %c0_0, %c0_1] : memref<1x16x128xf32, #tpu.memory_space<vmem>>, vector<1x16x128xf32>
    %7 = vector.shape_cast %6 : vector<1x16x128xf32> to vector<16x128xf32>
    %c0_2 = arith.constant 0 : index
    %c0_3 = arith.constant 0 : index
    %8 = vector.load %arg8[%c0_2, %c0_3] : memref<24x128xf32, #tpu.memory_space<vmem>>, vector<16x128xf32>
    tpu.vector_store %arg8[%c0_2, %c0_3], %7 {strides = array<i32>} : memref<24x128xf32, #tpu.memory_space<vmem>>, vector<16x128xf32>,
    %c0_4 = arith.constant 0 : index
    %c0_5 = arith.constant 0 : index
    %c0_6 = arith.constant 0 : index
    %9 = vector.load %arg5[%c0_4, %c0_5, %c0_6] : memref<1x8x128xf32, #tpu.memory_space<vmem>>, vector<1x8x128xf32>
    %10 = vector.shape_cast %9 : vector<1x8x128xf32> to vector<8x128xf32>
    %c0_7 = arith.constant 0 : index
    %c0_8 = arith.constant 0 : index
    %11 = vector.load %arg9[%c0_7, %c0_8] : memref<24x128xf32, #tpu.memory_space<vmem>>, vector<8x128xf32>
    tpu.vector_store %arg9[%c0_7, %c0_8], %10 {strides = array<i32>} : memref<24x128xf32, #tpu.memory_space<vmem>>, vector<8x128xf32>,
    %12 = tpu.iota {dimensions = array<i32: 0>} : vector<24x1xi32>
    %c0_9 = arith.constant 0 : index
    %c0_10 = arith.constant 0 : index
    %13 = vector.load %arg9[%c0_9, %c0_10] : memref<24x128xf32, #tpu.memory_space<vmem>>, vector<24x128xf32>
    %c1_i32_11 = arith.constant 1 : i32
    %14 = arith.addi %1, %c1_i32_11 : i32
    %15 = tpu.dynamic_rotate %13 by %14 dim 0 : vector<24x128xf32>, i32 -> vector<24x128xf32>
    %c0_12 = arith.constant 0 : index
    %c0_13 = arith.constant 0 : index
    %16 = vector.load %arg6[%c0_12, %c0_13] : memref<1x128xf32, #tpu.memory_space<vmem>>, vector<1x128xf32>
    %17 = vector.broadcast %1 : i32 to vector<24x1xi32>
    %18 = arith.cmpi slt, %12, %17 : vector<24x1xi32>
    %c0_14 = arith.constant 0 : index
    %c0_15 = arith.constant 0 : index
    %19 = vector.load %arg8[%c0_14, %c0_15] : memref<24x128xf32, #tpu.memory_space<vmem>>, vector<24x128xf32>
    %20 = vector.broadcast %1 : i32 to vector<24x1xi32>
    %21 = arith.cmpi eq, %12, %20 : vector<24x1xi32>
    %22 = vector.broadcast %5 : i32 to vector<24x1xi32>
    %23 = arith.cmpi slt, %12, %22 : vector<24x1xi32>
    %cst = arith.constant -1.000000e+00 : f32
    %24 = vector.shape_cast %23 : vector<24x1xi1> to vector<24x1xi1>
    %25 = vector.broadcast %24 : vector<24x1xi1> to vector<24x128xi1>
    %26 = vector.broadcast %cst : f32 to vector<24x128xf32>
    %27 = arith.select %25, %15, %26 : vector<24x128xi1>, vector<24x128xf32>
    %28 = vector.shape_cast %21 : vector<24x1xi1> to vector<24x1xi1>
    %29 = vector.broadcast %28 : vector<24x1xi1> to vector<24x128xi1>
    %30 = vector.shape_cast %16 : vector<1x128xf32> to vector<1x128xf32>
    %31 = vector.broadcast %30 : vector<1x128xf32> to vector<24x128xf32>
    %32 = arith.select %29, %31, %27 : vector<24x128xi1>, vector<24x128xf32>
    %33 = vector.shape_cast %18 : vector<24x1xi1> to vector<24x1xi1>
    %34 = vector.broadcast %33 : vector<24x1xi1> to vector<24x128xi1>
    %35 = arith.select %34, %19, %32 : vector<24x128xi1>, vector<24x128xf32>
    %36 = vector.extract_strided_slice %35 {offsets = [0, 0], sizes = [22, 128], strides = [1, 1]} : vector<24x128xf32> to vector<22x128xf32>
    %c0_16 = arith.constant 0 : index
    %c0_17 = arith.constant 0 : index
    %c0_18 = arith.constant 0 : index
    %37 = vector.load %arg7[%c0_16, %c0_17, %c0_18] : memref<1x22x128xf32, #tpu.memory_space<vmem>>, vector<1x22x128xf32>
    %38 = vector.shape_cast %37 : vector<1x22x128xf32> to vector<22x128xf32>
    %39 = vector.shape_cast %36 : vector<22x128xf32> to vector<1x22x128xf32>
    tpu.vector_store %arg7[%c0_16, %c0_17, %c0_18], %39 {strides = array<i32>} : memref<1x22x128xf32, #tpu.memory_space<vmem>>, vector<1x22x128xf32>,
    return
  }
  func.func @transform_0(%arg0: i32, %arg1: i32, %arg2: memref<2xi32, #tpu.memory_space<smem>>, %arg3: memref<2xi32, #tpu.memory_space<smem>>) -> (i32, i32, i32) {
    %c0_i32 = arith.constant 0 : i32
    %c0_i32_0 = arith.constant 0 : i32
    return %arg0, %c0_i32, %arg1 : i32, i32, i32
  }
  func.func @transform_1(%arg0: i32, %arg1: i32, %arg2: memref<2xi32, #tpu.memory_space<smem>>, %arg3: memref<2xi32, #tpu.memory_space<smem>>) -> (i32, i32, i32) {
    %c0_i32 = arith.constant 0 : i32
    %c0_i32_0 = arith.constant 0 : i32
    return %arg0, %c0_i32, %arg1 : i32, i32, i32
  }
  func.func @transform_2(%arg0: i32, %arg1: i32, %arg2: memref<2xi32, #tpu.memory_space<smem>>, %arg3: memref<2xi32, #tpu.memory_space<smem>>) -> (i32, i32) {
    %c0_i32 = arith.constant 0 : i32
    %c0_i32_0 = arith.constant 0 : i32
    return %c0_i32, %arg1 : i32, i32
  }
  func.func @transform_3(%arg0: i32, %arg1: i32, %arg2: memref<2xi32, #tpu.memory_space<smem>>, %arg3: memref<2xi32, #tpu.memory_space<smem>>) -> (i32, i32, i32) {
    %c0_i32 = arith.constant 0 : i32
    %c0_i32_0 = arith.constant 0 : i32
    return %arg0, %c0_i32, %arg1 : i32, i32, i32
  }
}

</mosaic_0001>

<bundles_post_ra>
// kernel: tpu_custom_call.1
= control target key start
LH: loop header
LB: loop body
LE: loop exit
PB: predicated region body
PF: predicated region fallthrough
CT: control target
= control target key end

     0   :  { %s721_s18 = smov [#allocation5]   ;;  %s903_s0 = inlined_call_operand.hbm [shape: s32[2], index: 0, kind: input, shape index: {}]   ;;  %s904_s2 = inlined_call_operand.hbm [shape: f32[2,16,128], index: 2, kind: input, shape index: {}]   ;;  %s905_s3 = inlined_call_operand.hbm [shape: f32[2,8,128], index: 3, kind: input, shape index: {}]   ;;  %s906_s4 = inlined_call_operand.vmem [shape: f32[1,128], index: 4, kind: input, shape index: {}]   ;;  %s907_s5 = inlined_call_operand.vmem [shape: f32[2,22,128], index: 5, kind: output, shape index: {}]   ;;  %s908_s1 = inlined_call_operand.vmem [shape: s32[2], index: 1, kind: input, shape index: {}]  }
   0x1   :  { %11 = dma.hbm_to_smem %s903_s0, 16, %s721_s18, [#allocation4] }
   0x2   :  { %s12_s23 = sshll.u32 %s908_s1, 4  ;;  %s13_s23 = int_to_ptr.vmem [resolvable:$true] %s12_s23 }
   0x3   :  { %s595_s24 = scalar_lea.vmem %s13_s23, 16  ;;  %p600_p1 = scmp.lt.s32.totalorder %s13_s23, %s13_s23 }
   0x4   :  { %p596_p0 = scmp.ne.s32.totalorder %s13_s23, %s595_s24  ;;  %p601_p2 = scmp.lt.s32.totalorder %s595_s24, %s595_s24 }
   0x6   :  { %p602_p3 = por %p601_p2, %p600_p1 }
   0x8   :  { %p603_p4 = pnand %p602_p3, %p596_p0 }
   0xa   :  { %606 = shalt.err (!%p603_p4)  }
   0xb   :  { %s722_s25 = smov [#allocation6]  }
   0xc   :  { %15 = dma.vmem_to_smem %s13_s23, 16, %s722_s25, [#allocation4] }
   0xd   :  { %687 = dma.done.wait [#allocation4], 32 }
   0xe   :  { %688 = vsyncadd [#allocation4], 4294967264 }
   0xf   :  { %17 = sfence }
  0x10   :  { %18 = vsyncpa [#allocation8], 0 }
  0x11   :  { %20 = vsyncpa [#allocation8 + $0x1], 0 }
  0x12   :  { %21 = vsyncpa [#allocation10], 0 }
  0x13   :  { %23 = vsyncpa [#allocation10 + $0x1], 0  ;;  %s763_s0 = smov 0   ;;  %s765_s1 = smov 0  }
  0x14   :  { %s767_s26 = smov 0   ;;  %s769_s27 = smov 0  }
  0x15   :  { %s771_s28 = smov 0   ;;  %s773_s29 = smov 0  }
  0x16 LB: > { %s501_s30 = sadd.s32 4294967295, %s719_s29   ;;  %s41_s6 = sadd.s32 1, %s715_s28  ;;  %s719_s29 = sphi %s773_s29, %s29_s29   ;;  %s715_s28 = sphi %s771_s28, %s917_s28   ;;  %s711_s27 = sphi %s769_s27, %s916_s27   ;;  %s707_s26 = sphi %s767_s26, %s915_s26   ;;  %s703_s1 = sphi %s765_s1, %s914_s1   ;;  %s699_s0 = sphi %s763_s0, %s913_s0  }
  0x17   : > { %p43_p5 = scmp.ge.s32.totalorder %s41_s6, 2  ;;  %s50_s7 = sadd.s32 1, %s707_s26 }
  0x18   : > { %p57_p6 = scmp.ne.s32.totalorder %s707_s26, %s703_s1  ;;  %p58_p7 = scmp.eq.s32.totalorder %s719_s29, 0 }
  0x19   : > { %s919_s6 = smov (%p43_p5, %s41_s6), 0  ;;  %p63_p9 = scmp.ne.s32.totalorder %s703_s1, %s699_s0 }
  0x1a   : > { %p799_p8 = por %p58_p7, %p57_p6  ;;  %s45_s9 = ssub.s32 %s715_s28, %s919_s6 }
  0x1b   : > { %p64_p10 = scmp.eq.s32.totalorder %s501_s30, 0  ;;  %p48_p11 = scmp.eq.s32.totalorder %s45_s9, 0 }
  0x1c   : > { %p531_p13 = scmp.lt.s32.totalorder %s719_s29, 2  ;;  %s815_s12 = sand.u32 1, %s707_s26  }
  0x1d   : > { %p806_p12 = por %p64_p10, %p63_p9  ;;  %s518_s13 = sshll.u32 %s715_s28, 8 }
  0x1e   : > { %s812_s11 = scalar_select %p48_p11, %s707_s26, %s50_s7  }
  0x1f   : > { %s506_s14 = sshll.u32 %s815_s12, 4  ;;  %s186_s17 = scalar_lea.hbm %s904_s2, %s518_s13 }
  0x20   : > { %s179_s18 = scalar_lea.vmem [#allocation7], %s506_s14  ;;  %p824_p0 = pnand %p531_p13, %p799_p8 }
  0x21   : > { %s187_s19 = sshll.u32 %s179_s18, 4  ;;  %s176_s21 = scalar_lea.sflag [#allocation8], %s815_s12  ;;  %s188_s19 = int_to_ptr.vmem [resolvable:$true] %s187_s19 }
  0x22   : > { %p609_p1 = pneg %p824_p0  ;;  %s620_s22 = scalar_lea.vmem %s188_s19, 256 }
  0x23   : > { %p621_p2 = scmp.ne.s32.totalorder %s188_s19, %s620_s22  ;;  %s723_s23 = smov [#allocation7]  }
  0x24   : > { %s625_s24 = sshll.u32 %s723_s23, 4  ;;  %s626_s24 = int_to_ptr.vmem [resolvable:$false] %s625_s24 }
  0x25   : > { %p623_p3 = pnand %p621_p2, %p609_p1  ;;  %s627_s25 = scalar_lea.vmem %s626_s24, 512 }
  0x26   : > { %p628_p5 = scmp.lt.s32.totalorder %s188_s19, %s626_s24  ;;  %p629_p6 = scmp.lt.s32.totalorder %s627_s25, %s620_s22 }
  0x27   : > { %p624_p4 = pneg %p623_p3 }
  0x28   : > { %p630_p7 = por %p629_p6, %p628_p5 }
  0x2a   : > { %p631_p8 = pnand %p630_p7, %p624_p4 }
  0x2c   : > { %634 = shalt.err (!%p631_p8)
}
  0x2d   : > { %s724_s0 = smov 128   ;;  %s725_s30 = smov 8  }
  0x2e   : > { %527 = dma.hbm_to_vmem [thread:$0]  (!%p824_p0), %s186_s17, 256, %s188_s19, %s176_s21, %s724_s0, %s724_s0, %s725_s30  }
  0x2f   : > { %p511_p9 = scmp.ge.s32.totalorder %s719_s29, 1  ;;  %p214_p10 = scmp.lt.s32.totalorder %s719_s29, 3 }
  0x30   : > { %s509_s7 = sshll.u32 %s815_s12, 3  ;;  %s510_s9 = sshll.u32 %s715_s28, 7 }
  0x31   : > { %p839_p11 = pnand %p511_p9, %p214_p10  ;;  %s201_s13 = scalar_lea.vmem [#allocation9], %s509_s7 }
  0x32   : > { %s209_s14 = sshll.u32 %s201_s13, 4  ;;  %s207_s18 = scalar_lea.hbm %s905_s3, %s510_s9  ;;  %s210_s14 = int_to_ptr.vmem [resolvable:$true] %s209_s14 }
  0x33   : > { %s198_s22 = scalar_lea.sflag [#allocation10], %s815_s12  ;;  %s648_s23 = scalar_lea.vmem %s210_s14, 128 }
  0x34   : > { %p649_p13 = scmp.ne.s32.totalorder %s210_s14, %s648_s23  ;;  %s726_s17 = smov [#allocation9]  }
  0x35   : > { %s653_s19 = sshll.u32 %s726_s17, 4  ;;  %s654_s19 = int_to_ptr.vmem [resolvable:$false] %s653_s19 }
  0x36   : > { %p651_p2 = pnand %p649_p13, %p609_p1  ;;  %s655_s21 = scalar_lea.vmem %s654_s19, 256 }
  0x37   : > { %p656_p4 = scmp.lt.s32.totalorder %s210_s14, %s654_s19  ;;  %p657_p5 = scmp.lt.s32.totalorder %s655_s21, %s648_s23 }
  0x38   : > { %p652_p3 = pneg %p651_p2 }
  0x39   : > { %p658_p6 = por %p657_p5, %p656_p4 }
  0x3b   : > { %p659_p7 = pnand %p658_p6, %p652_p3 }
  0x3d   : > { %662 = shalt.err (!%p659_p7)
}
  0x3e   : > { %530 = dma.hbm_to_vmem [thread:$0]  (!%p824_p0), %s207_s18, 128, %s210_s14, %s198_s22  }
  0x3f   : > { %218 = sbr.rel (%p839_p11) target bundleno = 102 (0x66), region = 32  ;;  %s220_s12 = sand.u32 (!%p839_p11), 1, %s703_s1  }
  0x40   : > { %s512_s24 = sshll.u32 (!%p839_p11), %s220_s12, 4  ;;  %s221_s25 = scalar_lea.sflag (!%p839_p11), [#allocation8], %s220_s12 }
  0x41   : > { %s224_s0 = scalar_lea.vmem (!%p839_p11), [#allocation7], %s512_s24 }
  0x44   : > { %690 = dma.done.wait (%p806_p12), %s221_s25, 256  }
  0x45   : > { %692 = vsyncadd (%p806_p12), %s221_s25, 4294967040  ;;  %s513_s30 = sshll.u32 %s220_s12, 3  ;;  %s230_s7 = scalar_lea.sflag [#allocation10], %s220_s12 }
  0x46   : > { %s233_s9 = scalar_lea.vmem [#allocation9], %s513_s30 }
  0x47   : > { %694 = dma.done.wait (%p806_p12), %s230_s7, 128  }
  0x48   : > { %696 = vsyncadd (%p806_p12), %s230_s7, 4294967168  ;;  %s278_s20 = sld [smem:[#allocation5 + %s711_s27]]  ;;  %v286_v0 = vld [vmem:[%s233_s9] sm:$0xff]  ;;  %v283_v2 = vld [vmem:[%s224_s0 + $0x8] sm:$0xff]  ;;  %v288_v3 = vlaneseq  ;;  %p270_p0 = scmp.lt.s32.totalorder %s711_s27, 1 }
  0x49   : > { %v282_v1 = vld [vmem:[%s224_s0] sm:$0xff]  ;;  %s279_s8 = sld [smem:[#allocation6 + %s711_s27]]  ;;  %v293_v8 = vld [vmem:[#allocation3] sm:$0xff]  ;;  %v294_v9 = vld [vmem:[#allocation3 + $0x10] sm:$0xff] }
  0x4a   : > { %v289_v4 = vshrl.u32 %v288_v3, 7  ;;  %s921_s27 = smov (!%p270_p0, %s711_s27), 1  ;;  %v515_v23 = vld [vmem:[%s906_s4] ss:$0 sm:$0xff]  ;;  %v330_v28 = vld [vmem:[#allocation2 + $0x8] sm:$0xff] }
  0x4b   : > { %s519_s17 = smul.u32 24, %s921_s27 }
  0x4c   : > { %v290_v6 = vadd.s32 8, %v289_v4  ;;  %v291_v7 = vadd.s32 16, %v289_v4 }
  0x4d   : > { %s277_s24 = scalar_lea.vmem %s907_s5, %s519_s17 }
  0x4e   : > { %s280_s13 = sadd.s32 1, %s278_s20  ;;  %v324_v5 = vstv %s278_s20 }
  0x4f   : > { %585 = sdivrem.u32 %s280_s13, 24  ;;  %s281_s14 = sadd.s32 %s280_s13, %s279_s8  ;;  %vm325_vm0 = vcmp.lt.s32.totalorder %v289_v4, %v324_v5  ;;  %vm331_vm1 = vcmp.eq.s32.totalorder %v289_v4, %v324_v5  ;;  %vm326_vm2 = vcmp.lt.s32.totalorder %v290_v6, %v324_v5  ;;  %vm332_vm3 = vcmp.eq.s32.totalorder %v290_v6, %v324_v5 }
  0x50   : > { %v334_v10 = vstv %s281_s14  ;;  %vm333_vm4 = vcmp.eq.s32.totalorder %v291_v7, %v324_v5  ;;  %vm327_vm11 = vcmp.lt.s32.totalorder %v291_v7, %v324_v5 }
  0x51   : > { %vm335_vm5 = vcmp.lt.s32.totalorder %v289_v4, %v334_v10  ;;  %vm336_vm7 = vcmp.lt.s32.totalorder %v290_v6, %v334_v10  ;;  %vm337_vm8 = vcmp.lt.s32.totalorder %v291_v7, %v334_v10 }
  0x58   : > { %s586_s10 = spop.drf %585 }
  0x59   : > { %s297_s15 = sand.u32 7, %s586_s10   ;;  %s298_s16 = sshrl.u32 %s586_s10, 3 }
  0x5a   : > { %s299_s18 = ssub.s32 8, %s297_s15  ;;  %v306_v11 = vstv %s297_s15  ;;  %s311_s22 = sand.u32 1, %s298_s16 }
  0x5b   : > { %v300_v12 = vstv %s299_s18  ;;  %v312_v13 = vstv %s311_s22  ;;  %s317_s23 = sand.u32 2, %s298_s16  ;;  %vm307_vm6 = vcmp.lt.s32.totalorder %v289_v4, %v306_v11 }
  0x5c   : > { %v301_v14 = vrot.slane %v286_v0, %v300_v12  ;;  %v303_v15 = vrot.slane %v293_v8, %v300_v12  ;;  %v305_v16 = vrot.slane %v294_v9, %v300_v12  ;;  %v318_v17 = vstv %s317_s23 }
  0x5d   : > { %vm313_vm9 = vcmp.ne.s32.totalorder %v312_v13, 0  ;;  %vm319_vm10 = vcmp.ne.s32.totalorder %v318_v17, 0 }
  0x5e   : > { %v308_v18 = vsel %vm307_vm6, %v303_v15, %v305_v16  ;;  %v309_v19 = vsel %vm307_vm6, %v301_v14, %v303_v15  ;;  %v310_v20 = vsel %vm307_vm6, %v305_v16, %v301_v14 }
  0x5f   : > { %v314_v21 = vsel %vm313_vm9, %v308_v18, %v310_v20  ;;  %v315_v22 = vsel %vm313_vm9, %v310_v20, %v309_v19  ;;  %v316_v24 = vsel %vm313_vm9, %v309_v19, %v308_v18 }
  0x60   : > { %v320_v25 = vsel %vm319_vm10, %v315_v22, %v314_v21  ;;  %v321_v26 = vsel %vm319_vm10, %v316_v24, %v315_v22  ;;  %v322_v27 = vsel %vm319_vm10, %v314_v21, %v316_v24 }
  0x61   : > { %v344_v29 = vsel %vm335_vm5, %v320_v25, -1.0  ;;  %v345_v30 = vsel %vm336_vm7, %v321_v26, -1.0  ;;  %v346_v31 = vsel %vm337_vm8, %v322_v27, -1.0 }
  0x62   : > { %v359_v32 = vsel %vm331_vm1, %v515_v23, %v344_v29  ;;  %v360_v33 = vsel %vm332_vm3, %v515_v23, %v345_v30  ;;  %v361_v34 = vsel %vm333_vm4, %v515_v23, %v346_v31 }
  0x63   : > { %v368_v35 = vsel %vm325_vm0, %v282_v1, %v359_v32  ;;  %v369_v36 = vsel %vm326_vm2, %v283_v2, %v360_v33  ;;  %v370_v37 = vsel %vm327_vm11, %v330_v28, %v361_v34 }
  0x64   : > { %371 = vst [vmem:[%s277_s24] sm:$0xff] %v368_v35  ;;  %372 = vst [vmem:[%s277_s24 + $0x8] sm:$0xff] %v369_v36 }
  0x65   : > { %373 = vst [vmem:[%s277_s24 + $0x10] sm:$0x3f] %v370_v37 }
  0x66 PF: > { %s29_s29 = sadd.s32 1, %s719_s29   ;;  %s913_s0 = smov %s703_s1 }
  0x67   : > { %p26_p12 = scmp.ge.s32.totalorder %s29_s29, 4   ;;  %s914_s1 = smov %s707_s26 }
  0x68   : > { %s915_s26 = smov %s812_s11  ;;  %s916_s27 = smov %s715_s28 }
  0x69   : > { %s917_s28 = smov %s919_s6  ;;  %28 = sbr.rel (!%p26_p12) target bundleno = 22 (0x16), region = 88 }
  0x6e   :  { %401 = vsyncpa [#allocation8], 1 }
  0x6f   :  { %403 = vsyncpa [#allocation8 + $0x1], 1 }
  0x70   :  { %404 = vsyncpa [#allocation10], 1 }
  0x71   :  { %406 = vsyncpa [#allocation10 + $0x1], 1 }

</bundles_post_ra>
